<compile_context>
chip_gen: v5e
topology: v5e:2x2
jax: 0.10.0
libtpu: 0.0.40
codegen_flags: <defaults>
</compile_context>

<pallas_src>
import jax
import jax.numpy as jnp
from jax import lax
from jax.experimental import pallas as pl
from jax.experimental.pallas import tpu as pltpu


# -----------------------------------------------------------------------------
# scipy-exact per-sample Gaussian taps (truncate = 4.0)
# -----------------------------------------------------------------------------
def _per_sample_taps(fwd_steps, blur_sigmas):
    sig_tab = jnp.asarray(blur_sigmas, jnp.float32)
    r_max = int(4.0 * float(max(blur_sigmas)) + 0.5)           # scipy: truncate = 4.0
    K = 2 * r_max + 1

    sig = sig_tab[fwd_steps]                                    # (B,)
    offs = jnp.arange(-r_max, r_max + 1)                        # (K,)
    # scipy radius_i = int(truncate * sigma_i + 0.5); taps outside it are zero.
    radius = jnp.floor(4.0 * sig + 0.5).astype(jnp.int32)       # (B,)
    in_support = jnp.abs(offs)[None, :] <= radius[:, None]      # (B, K)
    d2 = (offs.astype(jnp.float32) ** 2)[None, :]
    w = jnp.exp(-0.5 * d2 / (jnp.maximum(sig, 1e-20)[:, None] ** 2))
    w = jnp.where(in_support, w, 0.0)
    w = (w / jnp.sum(w, axis=1, keepdims=True)).astype(jnp.float32)   # (B, K)
    return w, r_max, K


def _reflect_index(p, n):
    # numpy 'symmetric' == scipy mode='reflect'; extension is periodic with period 2n,
    # so this is exact even when the filter radius exceeds the axis length.
    q = jnp.mod(p, 2 * n)
    return jnp.where(q < n, q, 2 * n - 1 - q)


def _axis_blur_matrices(w, n, r_max):
    """(B,K) taps -> (B,n,n) matrices M with out[j] = sum_i M[j,i] * x[i] (reflect folded in)."""
    offs = jnp.arange(-r_max, r_max + 1)                        # (K,)
    j = jnp.arange(n)
    idx = _reflect_index(j[None, :] + offs[:, None], n)         # (K, n_out)
    oh = jax.nn.one_hot(idx, n, dtype=jnp.float32)              # (K, n_out, n_in)
    return jnp.einsum("bk,kji->bji", w, oh)                     # (B, n_out, n_in)


# -----------------------------------------------------------------------------
# Pallas kernel: W pass + H pass on the MXU, tiny C mix on the VPU
# -----------------------------------------------------------------------------
def _make_blur_kernel(bb, B_total, C, H, W):
    CH = C * H

    def kernel(mc_ref, x_ref, mtw_ref, mh_ref, o_ref):
        # mc_ref : (B*C*C,) f32 in SMEM (scalar prefetch) -- per-sample channel-mix weights
        # x_ref  : (bb, C*H, W)   input samples (original dtype)
        # mtw_ref: (bb, W, W)     per-sample M_W.T  (f32)
        # mh_ref : (bb, H, H)     per-sample M_H    (f32)
        # o_ref  : (bb, C*H, W)
        i = pl.program_id(0)

        def body(s, carry):
            xs = x_ref[s].astype(jnp.float32)                            # (CH, W)
            # W pass (MXU, single pass, f32 accumulation)
            y = jnp.dot(xs, mtw_ref[s], preferred_element_type=jnp.float32)
            mhs = mh_ref[s]                                              # (H, H)
            # H pass: same M_H for every channel (C tiny & static -> bounded unroll)
            h = [jnp.dot(mhs, y[c * H:(c + 1) * H, :],
                         preferred_element_type=jnp.float32)
                 for c in range(C)]
            # C mix: out[c] = sum_{c'} M_C[c, c'] * h[c']   (scalars from SMEM, VPU adds)
            base = (i * bb + s) * (C * C)
            z_rows = []
            for c in range(C):
                zc = h[0] * mc_ref[base + c * C]
                for cp in range(1, C):
                    zc = zc + h[cp] * mc_ref[base + c * C + cp]
                z_rows.append(zc)
            o_ref[s] = jnp.concatenate(z_rows, axis=0).astype(o_ref.dtype)
            return carry

        if B_total % bb == 0:
            n_valid = bb                                                  # static trip count
        else:
            n_valid = jnp.minimum(bb, B_total - i * bb)                   # masked tail block
        lax.fori_loop(0, n_valid, body, 0)

    return kernel


# -----------------------------------------------------------------------------
# VMEM-budgeted batch-block sizing (generation-aware)
# -----------------------------------------------------------------------------
def _padded_bytes(rows, cols, itemsize):
    # (8,128) tile padding in VMEM
    return ((rows + 7) // 8) * 8 * ((cols + 127) // 128) * 128 * itemsize


def _vmem_caps():
    cap = 64 * 1024 * 1024                                     # conservative (v7x physical)
    try:
        info = pltpu.get_tpu_info()
        cap = int(getattr(info, "vmem_capacity_bytes", cap))
    except Exception:
        pass
    # v5e/v6e (128 MiB) -> 64 MiB scoped limit; v7x (64 MiB) -> 32 MiB. Always headroom.
    vmem_limit = min(max(cap // 2, 32 * 1024 * 1024), 64 * 1024 * 1024)
    budget = int(vmem_limit * 0.6)                             # DMA'd blocks stay under this
    return budget, vmem_limit


def _choose_batch_block(B, C, H, W, in_itemsize):
    """Largest batch block whose double-buffered DMA blocks + f32 temporaries fit the budget."""
    budget, vmem_limit = _vmem_caps()
    CH = C * H
    per_sample = 2 * (2 * _padded_bytes(CH, W, in_itemsize)    # x block + out block
                      + _padded_bytes(W, W, 4)                 # M_W.T
                      + _padded_bytes(H, H, 4))                # M_H
    temporaries = 4 * _padded_bytes(CH, W, 4)                  # xs, y, h[*], z (one sample live)
    avail = max(budget - temporaries, per_sample)
    bb = max(1, min(B, avail // per_sample))
    bb = min(bb, max(1, B // 2))     # >= 2 grid steps -> both TensorCores used on v7x
    return int(bb), vmem_limit


def gaussian_blur_naive(x, fwd_steps, blur_sigmas):
    """Pallas equivalent of GaussianBlurNaiveLayer.forward(x, fwd_steps)."""
    B, C, H, W = x.shape
    CH = C * H

    w, r_max, _ = _per_sample_taps(fwd_steps, blur_sigmas)
    m_w = _axis_blur_matrices(w, W, r_max)                      # (B, W, W)
    m_h = _axis_blur_matrices(w, H, r_max)                      # (B, H, H)
    m_c = _axis_blur_matrices(w, C, r_max)                      # (B, C, C)
    mt_w = jnp.transpose(m_w, (0, 2, 1))                        # x @ mt_w applies M_W
    mc_flat = m_c.reshape(B * C * C)                            # SMEM scalar-prefetch table

    x3 = x.reshape(B, CH, W)                                    # free reshape, no HBM copy
    bb, vmem_limit = _choose_batch_block(B, C, H, W, jnp.dtype(x.dtype).itemsize)

    out3 = pl.pallas_call(
        _make_blur_kernel(bb, B, C, H, W),
        out_shape=jax.ShapeDtypeStruct((B, CH, W), x.dtype),
        grid_spec=pltpu.PrefetchScalarGridSpec(
            num_scalar_prefetch=1,
            grid=(pl.cdiv(B, bb),),
            in_specs=[
                pl.BlockSpec((bb, CH, W), lambda i, mc: (i, 0, 0)),
                pl.BlockSpec((bb, W, W), lambda i, mc: (i, 0, 0)),
                pl.BlockSpec((bb, H, H), lambda i, mc: (i, 0, 0)),
            ],
            out_specs=pl.BlockSpec((bb, CH, W), lambda i, mc: (i, 0, 0)),
        ),
        compiler_params=pltpu.CompilerParams(
            dimension_semantics=("parallel",),                  # batch axis: 2 TCs on v7x
            vmem_limit_bytes=vmem_limit,
        ),
    )(mc_flat, x3, mt_w, m_h)
    return out3.reshape(B, C, H, W)


# -----------------------------------------------------------------------------
# Pure-JAX reference (independent shift-accumulate path) for a sanity check
# -----------------------------------------------------------------------------
def _reference(x, fwd_steps, blur_sigmas):
    B, C, H, W = x.shape
    w, r_max, K = _per_sample_taps(fwd_steps, blur_sigmas)
    xpad = jnp.pad(
        x.astype(jnp.float32),
        ((0, 0), (r_max, r_max), (r_max, r_max), (r_max, r_max)),
        mode="symmetric",                                       # == scipy mode='reflect'
    )

    def one(xp_i, w_i):
        t = sum(w_i[d] * xp_i[:, :, d:d + W] for d in range(K))
        t = sum(w_i[d] * t[:, d:d + H, :] for d in range(K))
        t = sum(w_i[d] * t[d:d + C, :, :] for d in range(K))
        return t.astype(x.dtype)

    return jax.vmap(one)(xpad, w)


if __name__ == "__main__":
    key = jax.random.PRNGKey(0)
    B, C, H, W = 2, 4, 16, 16
    blur_sigmas = [0.3, 0.5, 0.7, 0.8]            # deterministic "parameters" of the layer

    x = jax.random.normal(key, (B, C, H, W), dtype=jnp.float32)
    fwd_steps = jnp.array([1, 3], dtype=jnp.int32)

    out = jax.block_until_ready(gaussian_blur_naive(x, fwd_steps, blur_sigmas))
    ref = _reference(x, fwd_steps, blur_sigmas)

    assert out.shape == x.shape and out.dtype == x.dtype
    assert bool(jnp.all(jnp.isfinite(out)))
    max_err = float(jnp.max(jnp.abs(out.astype(jnp.float32) - ref.astype(jnp.float32))))
    # Single-pass bf16 MXU (default precision, f32 accumulation) trades ~1e-2 abs error for
    # 3-6x fewer MXU passes (perf review item 1); blur tolerance relaxed accordingly.
    assert max_err < 5e-2, f"max abs err {max_err}"
    print("KERNEL_OK")
</pallas_src>

<mosaic_0001>
module attributes {stable_mosaic.version = 11 : i64} {
  func.func @kernel(%arg0: i32, %arg1: memref<32xf32, #tpu.memory_space<smem>>, %arg2: memref<1x64x16xf32, #tpu.memory_space<vmem>>, %arg3: memref<1x16x16xf32, #tpu.memory_space<vmem>>, %arg4: memref<1x16x16xf32, #tpu.memory_space<vmem>>, %arg5: memref<1x64x16xf32, #tpu.memory_space<vmem>>) attributes {dimension_semantics = [#tpu.dimension_semantics<parallel>], iteration_bounds = array<i64: 2>, scalar_prefetch = 1 : i64, scratch_operands = 0 : i64, tpu.core_type = #tpu.core_type<tc>, window_params = [{transform_indices = @transform_0, window_bounds = array<i64: 1, 64, 16>}, {transform_indices = @transform_1, window_bounds = array<i64: 1, 16, 16>}, {transform_indices = @transform_2, window_bounds = array<i64: 1, 16, 16>}, {transform_indices = @transform_3, window_bounds = array<i64: 1, 64, 16>}]} {
    %c0_i32 = arith.constant 0 : i32
    %0 = arith.index_cast %c0_i32 : i32 to index
    %c0 = arith.constant 0 : index
    %c0_0 = arith.constant 0 : index
    %1 = vector.load %arg2[%0, %c0, %c0_0] : memref<1x64x16xf32, #tpu.memory_space<vmem>>, vector<1x64x16xf32>
    %2 = vector.shape_cast %1 : vector<1x64x16xf32> to vector<64x16xf32>
    %3 = arith.index_cast %c0_i32 : i32 to index
    %c0_1 = arith.constant 0 : index
    %c0_2 = arith.constant 0 : index
    %4 = vector.load %arg3[%3, %c0_1, %c0_2] : memref<1x16x16xf32, #tpu.memory_space<vmem>>, vector<1x16x16xf32>
    %5 = vector.shape_cast %4 : vector<1x16x16xf32> to vector<16x16xf32>
    %cst = arith.constant dense<0.000000e+00> : vector<64x16xf32>
    %6 = tpu.matmul %2, %5, %cst {dimension_numbers = #tpu.dot_dimension_numbers<[1], [0], [0], [1], [0, 0, 1, 1], [], []>} : vector<64x16xf32>, vector<16x16xf32>, vector<64x16xf32> -> vector<64x16xf32>
    %7 = arith.index_cast %c0_i32 : i32 to index
    %c0_3 = arith.constant 0 : index
    %c0_4 = arith.constant 0 : index
    %8 = vector.load %arg4[%7, %c0_3, %c0_4] : memref<1x16x16xf32, #tpu.memory_space<vmem>>, vector<1x16x16xf32>
    %9 = vector.shape_cast %8 : vector<1x16x16xf32> to vector<16x16xf32>
    %10 = vector.extract_strided_slice %6 {offsets = [0, 0], sizes = [16, 16], strides = [1, 1]} : vector<64x16xf32> to vector<16x16xf32>
    %cst_5 = arith.constant dense<0.000000e+00> : vector<16x16xf32>
    %11 = tpu.matmul %9, %10, %cst_5 {dimension_numbers = #tpu.dot_dimension_numbers<[1], [0], [0], [1], [0, 0, 1, 1], [], []>} : vector<16x16xf32>, vector<16x16xf32>, vector<16x16xf32> -> vector<16x16xf32>
    %12 = vector.extract_strided_slice %6 {offsets = [16, 0], sizes = [16, 16], strides = [1, 1]} : vector<64x16xf32> to vector<16x16xf32>
    %cst_6 = arith.constant dense<0.000000e+00> : vector<16x16xf32>
    %13 = tpu.matmul %9, %12, %cst_6 {dimension_numbers = #tpu.dot_dimension_numbers<[1], [0], [0], [1], [0, 0, 1, 1], [], []>} : vector<16x16xf32>, vector<16x16xf32>, vector<16x16xf32> -> vector<16x16xf32>
    %14 = vector.extract_strided_slice %6 {offsets = [32, 0], sizes = [16, 16], strides = [1, 1]} : vector<64x16xf32> to vector<16x16xf32>
    %cst_7 = arith.constant dense<0.000000e+00> : vector<16x16xf32>
    %15 = tpu.matmul %9, %14, %cst_7 {dimension_numbers = #tpu.dot_dimension_numbers<[1], [0], [0], [1], [0, 0, 1, 1], [], []>} : vector<16x16xf32>, vector<16x16xf32>, vector<16x16xf32> -> vector<16x16xf32>
    %16 = vector.extract_strided_slice %6 {offsets = [48, 0], sizes = [16, 16], strides = [1, 1]} : vector<64x16xf32> to vector<16x16xf32>
    %cst_8 = arith.constant dense<0.000000e+00> : vector<16x16xf32>
    %17 = tpu.matmul %9, %16, %cst_8 {dimension_numbers = #tpu.dot_dimension_numbers<[1], [0], [0], [1], [0, 0, 1, 1], [], []>} : vector<16x16xf32>, vector<16x16xf32>, vector<16x16xf32> -> vector<16x16xf32>
    %c1_i32 = arith.constant 1 : i32
    %18 = arith.muli %arg0, %c1_i32 : i32
    %19 = arith.addi %18, %c0_i32 : i32
    %c16_i32 = arith.constant 16 : i32
    %20 = arith.muli %19, %c16_i32 : i32
    %c0_i32_9 = arith.constant 0 : i32
    %21 = arith.addi %20, %c0_i32_9 : i32
    %22 = arith.index_cast %21 : i32 to index
    %23 = memref.load %arg1[%22] : memref<32xf32, #tpu.memory_space<smem>>
    %24 = vector.broadcast %23 : f32 to vector<16x16xf32>
    %25 = arith.mulf %11, %24 : vector<16x16xf32>
    %c0_i32_10 = arith.constant 0 : i32
    %26 = arith.addi %20, %c0_i32_10 : i32
    %c1_i32_11 = arith.constant 1 : i32
    %27 = arith.addi %26, %c1_i32_11 : i32
    %28 = arith.index_cast %27 : i32 to index
    %29 = memref.load %arg1[%28] : memref<32xf32, #tpu.memory_space<smem>>
    %30 = vector.broadcast %29 : f32 to vector<16x16xf32>
    %31 = arith.mulf %13, %30 : vector<16x16xf32>
    %32 = arith.addf %25, %31 : vector<16x16xf32>
    %c0_i32_12 = arith.constant 0 : i32
    %33 = arith.addi %20, %c0_i32_12 : i32
    %c2_i32 = arith.constant 2 : i32
    %34 = arith.addi %33, %c2_i32 : i32
    %35 = arith.index_cast %34 : i32 to index
    %36 = memref.load %arg1[%35] : memref<32xf32, #tpu.memory_space<smem>>
    %37 = vector.broadcast %36 : f32 to vector<16x16xf32>
    %38 = arith.mulf %15, %37 : vector<16x16xf32>
    %39 = arith.addf %32, %38 : vector<16x16xf32>
    %c0_i32_13 = arith.constant 0 : i32
    %40 = arith.addi %20, %c0_i32_13 : i32
    %c3_i32 = arith.constant 3 : i32
    %41 = arith.addi %40, %c3_i32 : i32
    %42 = arith.index_cast %41 : i32 to index
    %43 = memref.load %arg1[%42] : memref<32xf32, #tpu.memory_space<smem>>
    %44 = vector.broadcast %43 : f32 to vector<16x16xf32>
    %45 = arith.mulf %17, %44 : vector<16x16xf32>
    %46 = arith.addf %39, %45 : vector<16x16xf32>
    %c4_i32 = arith.constant 4 : i32
    %47 = arith.addi %20, %c4_i32 : i32
    %48 = arith.index_cast %47 : i32 to index
    %49 = memref.load %arg1[%48] : memref<32xf32, #tpu.memory_space<smem>>
    %50 = vector.broadcast %49 : f32 to vector<16x16xf32>
    %51 = arith.mulf %11, %50 : vector<16x16xf32>
    %c4_i32_14 = arith.constant 4 : i32
    %52 = arith.addi %20, %c4_i32_14 : i32
    %c1_i32_15 = arith.constant 1 : i32
    %53 = arith.addi %52, %c1_i32_15 : i32
    %54 = arith.index_cast %53 : i32 to index
    %55 = memref.load %arg1[%54] : memref<32xf32, #tpu.memory_space<smem>>
    %56 = vector.broadcast %55 : f32 to vector<16x16xf32>
    %57 = arith.mulf %13, %56 : vector<16x16xf32>
    %58 = arith.addf %51, %57 : vector<16x16xf32>
    %c4_i32_16 = arith.constant 4 : i32
    %59 = arith.addi %20, %c4_i32_16 : i32
    %c2_i32_17 = arith.constant 2 : i32
    %60 = arith.addi %59, %c2_i32_17 : i32
    %61 = arith.index_cast %60 : i32 to index
    %62 = memref.load %arg1[%61] : memref<32xf32, #tpu.memory_space<smem>>
    %63 = vector.broadcast %62 : f32 to vector<16x16xf32>
    %64 = arith.mulf %15, %63 : vector<16x16xf32>
    %65 = arith.addf %58, %64 : vector<16x16xf32>
    %c4_i32_18 = arith.constant 4 : i32
    %66 = arith.addi %20, %c4_i32_18 : i32
    %c3_i32_19 = arith.constant 3 : i32
    %67 = arith.addi %66, %c3_i32_19 : i32
    %68 = arith.index_cast %67 : i32 to index
    %69 = memref.load %arg1[%68] : memref<32xf32, #tpu.memory_space<smem>>
    %70 = vector.broadcast %69 : f32 to vector<16x16xf32>
    %71 = arith.mulf %17, %70 : vector<16x16xf32>
    %72 = arith.addf %65, %71 : vector<16x16xf32>
    %c8_i32 = arith.constant 8 : i32
    %73 = arith.addi %20, %c8_i32 : i32
    %74 = arith.index_cast %73 : i32 to index
    %75 = memref.load %arg1[%74] : memref<32xf32, #tpu.memory_space<smem>>
    %76 = vector.broadcast %75 : f32 to vector<16x16xf32>
    %77 = arith.mulf %11, %76 : vector<16x16xf32>
    %c8_i32_20 = arith.constant 8 : i32
    %78 = arith.addi %20, %c8_i32_20 : i32
    %c1_i32_21 = arith.constant 1 : i32
    %79 = arith.addi %78, %c1_i32_21 : i32
    %80 = arith.index_cast %79 : i32 to index
    %81 = memref.load %arg1[%80] : memref<32xf32, #tpu.memory_space<smem>>
    %82 = vector.broadcast %81 : f32 to vector<16x16xf32>
    %83 = arith.mulf %13, %82 : vector<16x16xf32>
    %84 = arith.addf %77, %83 : vector<16x16xf32>
    %c8_i32_22 = arith.constant 8 : i32
    %85 = arith.addi %20, %c8_i32_22 : i32
    %c2_i32_23 = arith.constant 2 : i32
    %86 = arith.addi %85, %c2_i32_23 : i32
    %87 = arith.index_cast %86 : i32 to index
    %88 = memref.load %arg1[%87] : memref<32xf32, #tpu.memory_space<smem>>
    %89 = vector.broadcast %88 : f32 to vector<16x16xf32>
    %90 = arith.mulf %15, %89 : vector<16x16xf32>
    %91 = arith.addf %84, %90 : vector<16x16xf32>
    %c8_i32_24 = arith.constant 8 : i32
    %92 = arith.addi %20, %c8_i32_24 : i32
    %c3_i32_25 = arith.constant 3 : i32
    %93 = arith.addi %92, %c3_i32_25 : i32
    %94 = arith.index_cast %93 : i32 to index
    %95 = memref.load %arg1[%94] : memref<32xf32, #tpu.memory_space<smem>>
    %96 = vector.broadcast %95 : f32 to vector<16x16xf32>
    %97 = arith.mulf %17, %96 : vector<16x16xf32>
    %98 = arith.addf %91, %97 : vector<16x16xf32>
    %c12_i32 = arith.constant 12 : i32
    %99 = arith.addi %20, %c12_i32 : i32
    %100 = arith.index_cast %99 : i32 to index
    %101 = memref.load %arg1[%100] : memref<32xf32, #tpu.memory_space<smem>>
    %102 = vector.broadcast %101 : f32 to vector<16x16xf32>
    %103 = arith.mulf %11, %102 : vector<16x16xf32>
    %c12_i32_26 = arith.constant 12 : i32
    %104 = arith.addi %20, %c12_i32_26 : i32
    %c1_i32_27 = arith.constant 1 : i32
    %105 = arith.addi %104, %c1_i32_27 : i32
    %106 = arith.index_cast %105 : i32 to index
    %107 = memref.load %arg1[%106] : memref<32xf32, #tpu.memory_space<smem>>
    %108 = vector.broadcast %107 : f32 to vector<16x16xf32>
    %109 = arith.mulf %13, %108 : vector<16x16xf32>
    %110 = arith.addf %103, %109 : vector<16x16xf32>
    %c12_i32_28 = arith.constant 12 : i32
    %111 = arith.addi %20, %c12_i32_28 : i32
    %c2_i32_29 = arith.constant 2 : i32
    %112 = arith.addi %111, %c2_i32_29 : i32
    %113 = arith.index_cast %112 : i32 to index
    %114 = memref.load %arg1[%113] : memref<32xf32, #tpu.memory_space<smem>>
    %115 = vector.broadcast %114 : f32 to vector<16x16xf32>
    %116 = arith.mulf %15, %115 : vector<16x16xf32>
    %117 = arith.addf %110, %116 : vector<16x16xf32>
    %c12_i32_30 = arith.constant 12 : i32
    %118 = arith.addi %20, %c12_i32_30 : i32
    %c3_i32_31 = arith.constant 3 : i32
    %119 = arith.addi %118, %c3_i32_31 : i32
    %120 = arith.index_cast %119 : i32 to index
    %121 = memref.load %arg1[%120] : memref<32xf32, #tpu.memory_space<smem>>
    %122 = vector.broadcast %121 : f32 to vector<16x16xf32>
    %123 = arith.mulf %17, %122 : vector<16x16xf32>
    %124 = arith.addf %117, %123 : vector<16x16xf32>
    %125 = tpu.concatenate %46, %72, %98, %124 in 0 : vector<16x16xf32>, vector<16x16xf32>, vector<16x16xf32>, vector<16x16xf32> -> vector<64x16xf32>
    %126 = arith.index_cast %c0_i32 : i32 to index
    %c0_32 = arith.constant 0 : index
    %c0_33 = arith.constant 0 : index
    %127 = vector.load %arg5[%126, %c0_32, %c0_33] : memref<1x64x16xf32, #tpu.memory_space<vmem>>, vector<1x64x16xf32>
    %128 = vector.shape_cast %127 : vector<1x64x16xf32> to vector<64x16xf32>
    %129 = vector.shape_cast %125 : vector<64x16xf32> to vector<1x64x16xf32>
    tpu.vector_store %arg5[%126, %c0_32, %c0_33], %129 {strides = array<i32>} : memref<1x64x16xf32, #tpu.memory_space<vmem>>, vector<1x64x16xf32>,
    %c1_i32_34 = arith.constant 1 : i32
    return
  }
  func.func @transform_0(%arg0: i32, %arg1: memref<32xf32, #tpu.memory_space<smem>>) -> (i32, i32, i32) {
    %c0_i32 = arith.constant 0 : i32
    %c0_i32_0 = arith.constant 0 : i32
    %c0_i32_1 = arith.constant 0 : i32
    return %arg0, %c0_i32, %c0_i32_0 : i32, i32, i32
  }
  func.func @transform_1(%arg0: i32, %arg1: memref<32xf32, #tpu.memory_space<smem>>) -> (i32, i32, i32) {
    %c0_i32 = arith.constant 0 : i32
    %c0_i32_0 = arith.constant 0 : i32
    %c0_i32_1 = arith.constant 0 : i32
    return %arg0, %c0_i32, %c0_i32_0 : i32, i32, i32
  }
  func.func @transform_2(%arg0: i32, %arg1: memref<32xf32, #tpu.memory_space<smem>>) -> (i32, i32, i32) {
    %c0_i32 = arith.constant 0 : i32
    %c0_i32_0 = arith.constant 0 : i32
    %c0_i32_1 = arith.constant 0 : i32
    return %arg0, %c0_i32, %c0_i32_0 : i32, i32, i32
  }
  func.func @transform_3(%arg0: i32, %arg1: memref<32xf32, #tpu.memory_space<smem>>) -> (i32, i32, i32) {
    %c0_i32 = arith.constant 0 : i32
    %c0_i32_0 = arith.constant 0 : i32
    %c0_i32_1 = arith.constant 0 : i32
    return %arg0, %c0_i32, %c0_i32_0 : i32, i32, i32
  }
}

</mosaic_0001>

<bundles_post_ra>
// kernel: tpu_custom_call.1
= control target key start
LH: loop header
LB: loop body
LE: loop exit
PB: predicated region body
PF: predicated region fallthrough
CT: control target
= control target key end

     0   :  { %s658_s18 = smov [#allocation3]   ;;  %s827_s0 = inlined_call_operand.vmem [shape: f32[32], index: 0, kind: input, shape index: {}]   ;;  %s828_s1 = inlined_call_operand.vmem [shape: f32[2,64,16], index: 1, kind: input, shape index: {}]   ;;  %s829_s2 = inlined_call_operand.vmem [shape: f32[2,16,16], index: 2, kind: input, shape index: {}]   ;;  %s830_s3 = inlined_call_operand.vmem [shape: f32[2,16,16], index: 3, kind: input, shape index: {}]   ;;  %s831_s4 = inlined_call_operand.vmem [shape: f32[2,64,16], index: 4, kind: output, shape index: {}]  }
   0x1   :  { %s10_s17 = sshll.u32 %s827_s0, 4  ;;  %s11_s17 = int_to_ptr.vmem [resolvable:$true] %s10_s17 }
   0x2   :  { %13 = dma.vmem_to_smem %s11_s17, 16, %s658_s18, [#allocation2] }
   0x3   :  { %652 = dma.done.wait [#allocation2], 16 }
   0x4   :  { %653 = vsyncadd [#allocation2], 4294967280 }
   0x5   :  { %16 = sfence }
   0x6   :  { %s687_s19 = smov 0  }
   0x7 LB: > { %s693_s20 = sadd.s32 4294967295, %s656_s19   ;;  %p591_p0 = scmp.ge.s32.totalorder %s656_s19, 1  ;;  %s656_s19 = sphi %s687_s19, %s22_s19  }
   0x8   : > { %p166_p1 = scmp.lt.s32.totalorder %s656_s19, 3 }
   0xa   : > { %p167_p2 = pnand %p591_p0, %p166_p1 }
   0xb   : > { %p200_p3 = scmp.lt.s32.totalorder (!%p167_p2), %s693_s20, 1  ;;  %s735_s6 = sshll.u32 (!%p167_p2), %s693_s20, 4 }
   0xc   : > { %170 = sbr.rel (%p167_p2) target bundleno = 330 (0x14a), region = 32  ;;  %s422_s7 = sadd.s32 (!%p167_p2), 4, %s735_s6 }
   0xd   : > { %s448_s8 = sadd.s32 (!%p167_p2), 8, %s735_s6  ;;  %s740_s9 = sld [smem:[#allocation3 + %s735_s6]] (!%p167_p2) }
   0xe   : > { %s474_s10 = sadd.s32 (!%p167_p2), 12, %s735_s6  ;;  %s743_s11 = sld [smem:[#allocation3 + %s422_s7]] (!%p167_p2) }
   0xf   : > { %s401_s12 = sadd.s32 (!%p167_p2), 1, %s735_s6  ;;  %s746_s13 = sld [smem:[#allocation3 + %s448_s8]] (!%p167_p2) }
  0x10   : > { %s427_s14 = sadd.s32 (!%p167_p2), 5, %s735_s6  ;;  %s749_s15 = sld [smem:[#allocation3 + %s474_s10]] (!%p167_p2) }
  0x11   : > { %s699_s0 = scalar_select %p200_p3, %s693_s20, 1  ;;  %vm230_vm0 = vcmask 130048  }
  0x12   : > { %s453_s16 = sadd.s32 9, %s735_s6  ;;  %s752_s17 = sld [smem:[#allocation3 + %s401_s12]] }
  0x13   : > { %s619_s21 = sshll.u32 %s699_s0, 6  ;;  %s620_s22 = sshll.u32 %s699_s0, 4  ;;  %v398_v23 = vstv %s740_s9 }
  0x14   : > { %s204_s25 = scalar_lea.vmem %s828_s1, %s619_s21  ;;  %s209_s28 = scalar_lea.vmem %s829_s2, %s620_s22  ;;  %v424_v24 = vstv %s743_s11 }
  0x15   : > { %v229_v0 = vld [vmem:[%s209_s28 + $0x8] sm:$0xff]  ;;  %v228_v1 = vld [vmem:[%s209_s28] sm:$0xff]  ;;  %v226_v4 = vld [vmem:[%s204_s25 + $0x30] sm:$0xff]  ;;  %s214_s5 = scalar_lea.vmem %s830_s3, %s620_s22  ;;  %s479_s18 = sadd.s32 13, %s735_s6  ;;  %v450_v25 = vstv %s746_s13 }
  0x16   : > { %269 = vmatpush.msra.mxu0 %v229_v0  ;;  %623 = vmatpush.msra.mxu2 %v229_v0  ;;  %v220_v2 = vld [vmem:[%s204_s25] sm:$0xff]  ;;  %v221_v5 = vld [vmem:[%s204_s25 + $0x8] sm:$0xff]  ;;  %v227_v7 = vld [vmem:[%s204_s25 + $0x38] sm:$0xff]  ;;  %s755_s20 = sld [smem:[#allocation3 + %s427_s14]]  ;;  %s408_s22 = sadd.s32 2, %s735_s6  ;;  %v476_v26 = vstv %s749_s15 }
  0x17   : > { %v224_v3 = vld [vmem:[%s204_s25 + $0x20] sm:$0xff]  ;;  %624 = vmatpush.msra.mxu3 %v229_v0  ;;  %v225_v6 = vld [vmem:[%s204_s25 + $0x28] sm:$0xff]  ;;  %v222_v8 = vld [vmem:[%s204_s25 + $0x10] sm:$0xff]  ;;  %s758_s23 = sld [smem:[#allocation3 + %s453_s16]]  ;;  %s434_s24 = sadd.s32 6, %s735_s6 }
  0x18   : > { %270 = vmatpush.msra.mxu0 %v228_v1  ;;  %625 = vmatpush.msra.mxu2 %v228_v1  ;;  %v223_v9 = vld [vmem:[%s204_s25 + $0x18] sm:$0xff]  ;;  %v296_v14 = vld [vmem:[%s214_s5] sm:$0xff]  ;;  %v297_v18 = vld [vmem:[%s214_s5 + $0x8] sm:$0xff]  ;;  %s761_s25 = sld [smem:[#allocation3 + %s479_s18]]  ;;  %s460_s26 = sadd.s32 10, %s735_s6  ;;  %v403_v27 = vstv %s752_s17 }
  0x19   : > { %600 = vmatmul.msk.f32.vlgmr.msra.gmra.mxu0 %vm230_vm0, %v220_v2  ;;  %604 = vmatmul.msk.f32.vlgmr.msra.gmra.mxu2 %vm230_vm0, %v224_v3  ;;  %s764_s27 = sld [smem:[#allocation3 + %s408_s22]]  ;;  %s486_s28 = sadd.s32 14, %s735_s6 }
  0x1a   : > { %626 = vmatpush.msra.mxu3 %v228_v1  ;;  %s767_s29 = sld [smem:[#allocation3 + %s434_s24]]  ;;  %s415_s30 = sadd.s32 3, %s735_s6 }
  0x1b   : > { %606 = vmatmul.msk.f32.vlgmr.msra.gmra.mxu3 %vm230_vm0, %v226_v4  ;;  %s770_s5 = sld [smem:[#allocation3 + %s460_s26]]  ;;  %s441_s7 = sadd.s32 7, %s735_s6 }
  0x1c   : > { %s773_s8 = sld [smem:[#allocation3 + %s486_s28]]  ;;  %s467_s10 = sadd.s32 11, %s735_s6  ;;  %v429_v28 = vstv %s755_s20 }
  0x1d   : > { %s776_s12 = sld [smem:[#allocation3 + %s415_s30]]  ;;  %s493_s14 = sadd.s32 15, %s735_s6  ;;  %v455_v29 = vstv %s758_s23 }
  0x1e   : > { %s779_s16 = sld [smem:[#allocation3 + %s441_s7]]  ;;  %v481_v30 = vstv %s761_s25  ;;  %s806_s11 = scalar_lea.vmem %s831_s4, %s619_s21 }
  0x1f   : > { %s781_s18 = sld [smem:[#allocation3 + %s467_s10]]  ;;  %v410_v32 = vstv %s764_s27 }
  0x20   : > { %s783_s22 = sld [smem:[#allocation3 + %s493_s14]]  ;;  %v436_v33 = vstv %s767_s29 }
  0x21   : > { %601 = vmatmul.msk.f32.gmra.mxu0 %vm230_vm0, %v221_v5  ;;  %605 = vmatmul.msk.f32.gmra.mxu2 %vm230_vm0, %v225_v6  ;;  %v462_v34 = vstv %s770_s5 }
  0x22   : > { %v488_v35 = vstv %s773_s8 }
  0x23   : > { %607 = vmatmul.msk.f32.gmra.mxu3 %vm230_vm0, %v227_v7  ;;  %v417_v36 = vstv %s776_s12 }
  0x24   : > { %v443_v37 = vstv %s779_s16 }
  0x25   : > { %v469_v38 = vstv %s781_s18 }
  0x26   : > { %v495_v39 = vstv %s783_s22 }
  0x29   : > { %602 = vmatmul.msk.f32.gmra.mxu0 %vm230_vm0, %v222_v8 }
  0x31   : > { %603 = vmatmul.msk.f32.gmra.mxu0 %vm230_vm0, %v223_v9 }
  0x96   : > { %v272_v10 = vpop.f32.mrf.mxu0 }
  0x9c   : > { %v284_v11 = vpop.f32.mrf.mxu2 }
  0x9e   : > { %v275_v12 = vpop.f32.mrf.mxu0  ;;  %v290_v13 = vpop.f32.mrf.mxu3 }
  0x9f   : > { %318 = vmatpush.msra.mxu1 %v275_v12 }
  0xa1   : > { %319 = vmatpush.msra.mxu1 %v272_v10 }
  0xa2   : > { %608 = vmatmul.msk.f32.vlgmr.msra.gmra.mxu1 %vm230_vm0, %v296_v14 }
  0xa4   : > { %v287_v15 = vpop.f32.mrf.mxu2 }
  0xa5   : > { %364 = vmatpush.msrb.mxu3 %v287_v15 }
  0xa6   : > { %v278_v16 = vpop.f32.mrf.mxu0  ;;  %v293_v17 = vpop.f32.mrf.mxu3 }
  0xa7   : > { %365 = vmatpush.msrb.mxu3 %v284_v11  ;;  %387 = vmatpush.msrb.mxu1 %v293_v17 }
  0xa8   : > { %612 = vmatmul.msk.f32.vlgmr.msrb.gmra.mxu3 %vm230_vm0, %v296_v14 }
  0xa9   : > { %388 = vmatpush.msrb.mxu1 %v290_v13 }
  0xaa   : > { %609 = vmatmul.msk.f32.gmra.mxu1 %vm230_vm0, %v297_v18 }
  0xae   : > { %v281_v19 = vpop.f32.mrf.mxu0 }
  0xaf   : > { %341 = vmatpush.msrb.mxu2 %v281_v19 }
  0xb0   : > { %613 = vmatmul.msk.f32.gmra.mxu3 %vm230_vm0, %v297_v18 }
  0xb1   : > { %342 = vmatpush.msrb.mxu2 %v278_v16 }
  0xb2   : > { %610 = vmatmul.msk.f32.vlgmr.msrb.gmra.mxu2 %vm230_vm0, %v296_v14  ;;  %614 = vmatmul.msk.f32.vlgmr.msrb.gmra.mxu1 %vm230_vm0, %v296_v14 }
  0xba   : > { %611 = vmatmul.msk.f32.gmra.mxu2 %vm230_vm0, %v297_v18  ;;  %615 = vmatmul.msk.f32.gmra.mxu1 %vm230_vm0, %v297_v18 }
 0x11f   : > { %v321_v20 = vpop.f32.mrf.mxu1 }
 0x120   : > { %v399_v40 = vmul.f32 %v398_v23, %v321_v20  ;;  %v425_v41 = vmul.f32 %v424_v24, %v321_v20  ;;  %v451_v42 = vmul.f32 %v450_v25, %v321_v20  ;;  %v477_v43 = vmul.f32 %v476_v26, %v321_v20 }
 0x127   : > { %v324_v21 = vpop.f32.mrf.mxu1 }
 0x128   : > { %v400_v2 = vmul.f32 %v398_v23, %v324_v21  ;;  %v426_v3 = vmul.f32 %v424_v24, %v324_v21  ;;  %v452_v4 = vmul.f32 %v450_v25, %v324_v21  ;;  %v478_v5 = vmul.f32 %v476_v26, %v324_v21 }
 0x12b   : > { %v367_v22 = vpop.f32.mrf.mxu3 }
 0x12c   : > { %v411_v45 = vmul.f32 %v410_v32, %v367_v22  ;;  %v437_v46 = vmul.f32 %v436_v33, %v367_v22  ;;  %v463_v47 = vmul.f32 %v462_v34, %v367_v22  ;;  %v489_v48 = vmul.f32 %v488_v35, %v367_v22 }
 0x12f   : > { %v390_v31 = vpop.f32.mrf.mxu1 }
 0x130   : > { %v418_v53 = vmul.f32 %v417_v36, %v390_v31  ;;  %v444_v54 = vmul.f32 %v443_v37, %v390_v31  ;;  %v470_v55 = vmul.f32 %v469_v38, %v390_v31  ;;  %v496_v61 = vmul.f32 %v495_v39, %v390_v31 }
 0x133   : > { %v370_v60 = vpop.f32.mrf.mxu3 }
 0x134   : > { %v412_v6 = vmul.f32 %v410_v32, %v370_v60  ;;  %v438_v12 = vmul.f32 %v436_v33, %v370_v60  ;;  %v464_v13 = vmul.f32 %v462_v34, %v370_v60  ;;  %v490_v14 = vmul.f32 %v488_v35, %v370_v60 }
 0x135   : > { %v344_v44 = vpop.f32.mrf.mxu2 }
 0x136   : > { %v404_v49 = vmul.f32 %v403_v27, %v344_v44  ;;  %v430_v50 = vmul.f32 %v429_v28, %v344_v44  ;;  %v456_v51 = vmul.f32 %v455_v29, %v344_v44  ;;  %v482_v52 = vmul.f32 %v481_v30, %v344_v44 }
 0x137   : > { %v393_v7 = vpop.f32.mrf.mxu1 }
 0x138   : > { %v406_v56 = vadd.f32 %v404_v49, %v399_v40  ;;  %v432_v57 = vadd.f32 %v430_v50, %v425_v41  ;;  %v458_v58 = vadd.f32 %v456_v51, %v451_v42  ;;  %v484_v59 = vadd.f32 %v482_v52, %v477_v43 }
 0x139   : > { %v419_v20 = vmul.f32 %v417_v36, %v393_v7  ;;  %v445_v21 = vmul.f32 %v443_v37, %v393_v7  ;;  %v471_v22 = vmul.f32 %v469_v38, %v393_v7 }
 0x13a   : > { %v413_v62 = vadd.f32 %v411_v45, %v406_v56  ;;  %v439_v63 = vadd.f32 %v437_v46, %v432_v57  ;;  %v465_v0 = vadd.f32 %v463_v47, %v458_v58  ;;  %v491_v1 = vadd.f32 %v489_v48, %v484_v59 }
 0x13c   : > { %v420_v8 = vadd.f32 %v418_v53, %v413_v62  ;;  %v446_v9 = vadd.f32 %v444_v54, %v439_v63  ;;  %v472_v10 = vadd.f32 %v470_v55, %v465_v0  ;;  %v498_v15 = vadd.f32 %v496_v61, %v491_v1 }
 0x13d   : > { %v347_v11 = vpop.f32.mrf.mxu2 }
 0x13e   : > { %v405_v16 = vmul.f32 %v403_v27, %v347_v11  ;;  %v431_v17 = vmul.f32 %v429_v28, %v347_v11  ;;  %v457_v18 = vmul.f32 %v455_v29, %v347_v11  ;;  %v483_v19 = vmul.f32 %v481_v30, %v347_v11  ;;  %500 = vst.msk [vmem:[%s806_s11] sm:$0xff] %vm230_vm0, %v420_v8 }
 0x13f   : > { %502 = vst.msk [vmem:[%s806_s11 + $0x10] sm:$0xff] %vm230_vm0, %v446_v9  ;;  %v497_v27 = vmul.f32 %v495_v39, %v393_v7 }
 0x140   : > { %v407_v23 = vadd.f32 %v405_v16, %v400_v2  ;;  %v433_v24 = vadd.f32 %v431_v17, %v426_v3  ;;  %v459_v25 = vadd.f32 %v457_v18, %v452_v4  ;;  %v485_v26 = vadd.f32 %v483_v19, %v478_v5  ;;  %504 = vst.msk [vmem:[%s806_s11 + $0x20] sm:$0xff] %vm230_vm0, %v472_v10 }
 0x141   : > { %506 = vst.msk [vmem:[%s806_s11 + $0x30] sm:$0xff] %vm230_vm0, %v498_v15 }
 0x142   : > { %v414_v28 = vadd.f32 %v412_v6, %v407_v23  ;;  %v440_v29 = vadd.f32 %v438_v12, %v433_v24  ;;  %v466_v30 = vadd.f32 %v464_v13, %v459_v25  ;;  %v492_v31 = vadd.f32 %v490_v14, %v485_v26 }
 0x144   : > { %v421_v32 = vadd.f32 %v419_v20, %v414_v28  ;;  %v447_v33 = vadd.f32 %v445_v21, %v440_v29  ;;  %v473_v34 = vadd.f32 %v471_v22, %v466_v30  ;;  %v499_v35 = vadd.f32 %v497_v27, %v492_v31 }
 0x146   : > { %501 = vst.msk [vmem:[%s806_s11 + $0x8] sm:$0xff] %vm230_vm0, %v421_v32 }
 0x147   : > { %503 = vst.msk [vmem:[%s806_s11 + $0x18] sm:$0xff] %vm230_vm0, %v447_v33 }
 0x148   : > { %505 = vst.msk [vmem:[%s806_s11 + $0x28] sm:$0xff] %vm230_vm0, %v473_v34 }
 0x149   : > { %507 = vst.msk [vmem:[%s806_s11 + $0x38] sm:$0xff] %vm230_vm0, %v499_v35 }
 0x14a PF: > { %s22_s19 = sadd.s32 1, %s656_s19  }
 0x14b   : > { %p19_p4 = scmp.ge.s32.totalorder %s22_s19, 4  }
 0x14d   :  { %21 = sbr.rel (!%p19_p4) target bundleno = 7 (0x7), region = 68 }

</bundles_post_ra>
